<compile_context>
chip_gen: v6e
topology: v6e:2x2x1
jax: 0.10.0
libtpu: 0.0.40
codegen_flags: <defaults>
</compile_context>

<pallas_src>
import jax
import jax.numpy as jnp
from jax.experimental import pallas as pl
from jax.experimental.pallas import tpu as pltpu

# Module hyperparameters (from the PyTorch script)
D_POS = 5
D_TOKENS = 3
D_MODEL = D_TOKENS + D_POS     # 8
SEQ_LEN = 20                   # fc2 output features
N_HIDDEN = 32

_LANE = 128
_SUBLANE = 8


def _round_up(x, m):
    return (x + m - 1) // m * m


def simple_nn_kernel(x_ref, w1_ref, b1_ref, w2_ref, b2_ref, o_ref):
    # One (block_m, d_model) tile of activations; weights/biases are resident.
    x = x_ref[...]
    h = jnp.dot(x, w1_ref[...], preferred_element_type=jnp.float32)
    h = jnp.maximum(h + b1_ref[...], 0.0)          # f32 bias-add + ReLU (VPU)
    y = jnp.dot(h.astype(w2_ref.dtype), w2_ref[...],
                preferred_element_type=jnp.float32)
    o_ref[...] = (y + b2_ref[...]).astype(o_ref.dtype)


def simple_nn(x, w1, b1, w2, b2, *, block_m=128, compute_dtype=None):
    """x: (B, d_model) -> (B, out_feat).  compute_dtype: matmul operand dtype
    (e.g. jnp.bfloat16 on v6e/v7x); accumulation / epilogue stay f32."""
    B, d_model = x.shape
    n_hidden = w1.shape[1]
    out_feat = w2.shape[1]

    cdt = jnp.dtype(compute_dtype) if compute_dtype is not None else jnp.dtype(x.dtype)
    out_dtype = x.dtype

    # --- lane-pad hidden and output dims to 128 (zeros are exact no-ops:
    #     relu(0 + 0) = 0 contributes nothing; padded output cols are sliced off).
    h_pad = _round_up(n_hidden, _LANE)
    n_pad = _round_up(out_feat, _LANE)

    w1_p = jnp.zeros((d_model, h_pad), cdt).at[:, :n_hidden].set(w1.astype(cdt))
    b1_p = jnp.zeros((1, h_pad), jnp.float32).at[:, :n_hidden].set(b1.astype(jnp.float32))
    w2_p = jnp.zeros((h_pad, n_pad), cdt).at[:n_hidden, :out_feat].set(w2.astype(cdt))
    b2_p = jnp.zeros((1, n_pad), jnp.float32).at[:, :out_feat].set(b2.astype(jnp.float32))

    # --- batch: pad to a multiple of 8 sublanes and tile over a parallel grid.
    tm = min(block_m, _round_up(B, _SUBLANE))
    tm = _round_up(tm, _SUBLANE)
    b_pad = _round_up(B, tm)
    x_p = x.astype(cdt)
    if b_pad != B:
        x_p = jnp.zeros((b_pad, d_model), cdt).at[:B].set(x_p)

    grid = (b_pad // tm,)

    itemsize = cdt.itemsize
    cost = pl.CostEstimate(
        flops=2 * b_pad * (d_model * h_pad + h_pad * n_pad),
        transcendentals=0,
        bytes_accessed=int(
            x_p.size * itemsize
            + w1_p.size * itemsize + w2_p.size * itemsize
            + b1_p.size * 4 + b2_p.size * 4
            + b_pad * n_pad * jnp.dtype(out_dtype).itemsize
        ),
    )

    out = pl.pallas_call(
        simple_nn_kernel,
        out_shape=jax.ShapeDtypeStruct((b_pad, n_pad), out_dtype),
        grid=grid,
        in_specs=[
            pl.BlockSpec((tm, d_model), lambda i: (i, 0)),       # x tile
            pl.BlockSpec((d_model, h_pad), lambda i: (0, 0)),    # w1 (resident)
            pl.BlockSpec((1, h_pad), lambda i: (0, 0)),          # b1 (resident)
            pl.BlockSpec((h_pad, n_pad), lambda i: (0, 0)),      # w2 (resident)
            pl.BlockSpec((1, n_pad), lambda i: (0, 0)),          # b2 (resident)
        ],
        out_specs=pl.BlockSpec((tm, n_pad), lambda i: (i, 0)),   # lane-dense store
        compiler_params=pltpu.CompilerParams(
            dimension_semantics=("parallel",),                    # v7x: both TCs
        ),
        cost_estimate=cost,
    )(x_p, w1_p, b1_p, w2_p, b2_p)

    return out[:B, :out_feat]


def init_params(key, d_model, n_hidden, seq_len):
    """Deterministic init mimicking nn.Linear's uniform(-1/sqrt(fan_in), +)."""
    k1, k2, k3, k4 = jax.random.split(key, 4)
    bound1 = 1.0 / jnp.sqrt(d_model)
    bound2 = 1.0 / jnp.sqrt(n_hidden)
    # Stored already transposed: (in_features, out_features)
    w1 = jax.random.uniform(k1, (d_model, n_hidden), jnp.float32, -bound1, bound1)
    b1 = jax.random.uniform(k2, (n_hidden,), jnp.float32, -bound1, bound1)
    w2 = jax.random.uniform(k3, (n_hidden, seq_len), jnp.float32, -bound2, bound2)
    b2 = jax.random.uniform(k4, (seq_len,), jnp.float32, -bound2, bound2)
    return w1, b1, w2, b2


if __name__ == "__main__":
    key = jax.random.PRNGKey(0)
    kx, kp = jax.random.split(key)

    batch = 4
    x = jax.random.normal(kx, (batch, D_MODEL), dtype=jnp.float32)
    w1, b1, w2, b2 = init_params(kp, D_MODEL, N_HIDDEN, SEQ_LEN)

    # Reference in plain JAX.
    ref = jnp.maximum(x @ w1 + b1, 0.0) @ w2 + b2

    # f32 path (exact check).
    out = simple_nn(x, w1, b1, w2, b2)
    out = jax.block_until_ready(out)
    assert out.shape == (batch, SEQ_LEN)
    assert jnp.allclose(out, ref, atol=1e-5, rtol=1e-5)

    # bf16 MXU-operand path (v6e/v7x fast path; f32 accumulation/epilogue).
    out_bf16 = simple_nn(x, w1, b1, w2, b2, compute_dtype=jnp.bfloat16)
    out_bf16 = jax.block_until_ready(out_bf16)
    assert out_bf16.shape == (batch, SEQ_LEN)
    assert jnp.allclose(out_bf16, ref, atol=1e-1, rtol=1e-1)

    print("KERNEL_OK")
</pallas_src>

<mosaic_0001>
module attributes {stable_mosaic.version = 11 : i64} {
  func.func @simple_nn_kernel(%arg0: i32, %arg1: memref<8x8xf32, #tpu.memory_space<vmem>>, %arg2: memref<8x128xf32, #tpu.memory_space<vmem>>, %arg3: memref<1x128xf32, #tpu.memory_space<vmem>>, %arg4: memref<128x128xf32, #tpu.memory_space<vmem>>, %arg5: memref<1x128xf32, #tpu.memory_space<vmem>>, %arg6: memref<8x128xf32, #tpu.memory_space<vmem>>) attributes {dimension_semantics = [#tpu.dimension_semantics<parallel>], iteration_bounds = array<i64: 1>, scalar_prefetch = 0 : i64, scratch_operands = 0 : i64, tpu.core_type = #tpu.core_type<tc>, window_params = [{transform_indices = @transform_0, window_bounds = array<i64: 8, 8>}, {pipeline_mode = #tpu.pipeline_mode<synchronous>, transform_indices = @transform_1, window_bounds = array<i64: 8, 128>}, {pipeline_mode = #tpu.pipeline_mode<synchronous>, transform_indices = @transform_2, window_bounds = array<i64: 1, 128>}, {pipeline_mode = #tpu.pipeline_mode<synchronous>, transform_indices = @transform_3, window_bounds = array<i64: 128, 128>}, {pipeline_mode = #tpu.pipeline_mode<synchronous>, transform_indices = @transform_4, window_bounds = array<i64: 1, 128>}, {transform_indices = @transform_5, window_bounds = array<i64: 8, 128>}]} {
    %c0 = arith.constant 0 : index
    %c0_0 = arith.constant 0 : index
    %0 = vector.load %arg1[%c0, %c0_0] : memref<8x8xf32, #tpu.memory_space<vmem>>, vector<8x8xf32>
    %c0_1 = arith.constant 0 : index
    %c0_2 = arith.constant 0 : index
    %1 = vector.load %arg2[%c0_1, %c0_2] : memref<8x128xf32, #tpu.memory_space<vmem>>, vector<8x128xf32>
    %cst = arith.constant dense<0.000000e+00> : vector<8x128xf32>
    %2 = tpu.matmul %0, %1, %cst {dimension_numbers = #tpu.dot_dimension_numbers<[1], [0], [0], [1], [0, 0, 1, 1], [], []>} : vector<8x8xf32>, vector<8x128xf32>, vector<8x128xf32> -> vector<8x128xf32>
    %c0_3 = arith.constant 0 : index
    %c0_4 = arith.constant 0 : index
    %3 = vector.load %arg3[%c0_3, %c0_4] : memref<1x128xf32, #tpu.memory_space<vmem>>, vector<1x128xf32>
    %4 = vector.broadcast %3 : vector<1x128xf32> to vector<8x128xf32>
    %5 = arith.addf %2, %4 : vector<8x128xf32>
    %cst_5 = arith.constant 0.000000e+00 : f32
    %6 = vector.broadcast %cst_5 : f32 to vector<8x128xf32>
    %7 = arith.maximumf %5, %6 : vector<8x128xf32>
    %c0_6 = arith.constant 0 : index
    %c0_7 = arith.constant 0 : index
    %8 = vector.load %arg4[%c0_6, %c0_7] : memref<128x128xf32, #tpu.memory_space<vmem>>, vector<128x128xf32>
    %cst_8 = arith.constant dense<0.000000e+00> : vector<8x128xf32>
    %9 = tpu.matmul %7, %8, %cst_8 {dimension_numbers = #tpu.dot_dimension_numbers<[1], [0], [0], [1], [0, 0, 1, 1], [], []>} : vector<8x128xf32>, vector<128x128xf32>, vector<8x128xf32> -> vector<8x128xf32>
    %c0_9 = arith.constant 0 : index
    %c0_10 = arith.constant 0 : index
    %10 = vector.load %arg5[%c0_9, %c0_10] : memref<1x128xf32, #tpu.memory_space<vmem>>, vector<1x128xf32>
    %11 = vector.broadcast %10 : vector<1x128xf32> to vector<8x128xf32>
    %12 = arith.addf %9, %11 : vector<8x128xf32>
    %c0_11 = arith.constant 0 : index
    %c0_12 = arith.constant 0 : index
    %13 = vector.load %arg6[%c0_11, %c0_12] : memref<8x128xf32, #tpu.memory_space<vmem>>, vector<8x128xf32>
    tpu.vector_store %arg6[%c0_11, %c0_12], %12 {strides = array<i32>} : memref<8x128xf32, #tpu.memory_space<vmem>>, vector<8x128xf32>,
    return
  }
  func.func @transform_0(%arg0: i32) -> (i32, i32) {
    %c0_i32 = arith.constant 0 : i32
    %c0_i32_0 = arith.constant 0 : i32
    return %arg0, %c0_i32 : i32, i32
  }
  func.func @transform_1(%arg0: i32) -> (i32, i32) {
    %c0_i32 = arith.constant 0 : i32
    %c0_i32_0 = arith.constant 0 : i32
    %c0_i32_1 = arith.constant 0 : i32
    return %c0_i32, %c0_i32_0 : i32, i32
  }
  func.func @transform_2(%arg0: i32) -> (i32, i32) {
    %c0_i32 = arith.constant 0 : i32
    %c0_i32_0 = arith.constant 0 : i32
    %c0_i32_1 = arith.constant 0 : i32
    return %c0_i32, %c0_i32_0 : i32, i32
  }
  func.func @transform_3(%arg0: i32) -> (i32, i32) {
    %c0_i32 = arith.constant 0 : i32
    %c0_i32_0 = arith.constant 0 : i32
    %c0_i32_1 = arith.constant 0 : i32
    return %c0_i32, %c0_i32_0 : i32, i32
  }
  func.func @transform_4(%arg0: i32) -> (i32, i32) {
    %c0_i32 = arith.constant 0 : i32
    %c0_i32_0 = arith.constant 0 : i32
    %c0_i32_1 = arith.constant 0 : i32
    return %c0_i32, %c0_i32_0 : i32, i32
  }
  func.func @transform_5(%arg0: i32) -> (i32, i32) {
    %c0_i32 = arith.constant 0 : i32
    %c0_i32_0 = arith.constant 0 : i32
    return %arg0, %c0_i32 : i32, i32
  }
}

</mosaic_0001>

<bundles_post_ra>
// kernel: tpu_custom_call.1
= control target key start
LH: loop header
LB: loop body
LE: loop exit
PB: predicated region body
PF: predicated region fallthrough
CT: control target
= control target key end

     0   :  { %10 = vsyncpa [#allocation3], 0  ;;  %s464_s0 = inlined_call_operand.hbm [shape: f32[8,8], index: 0, kind: input, shape index: {}]   ;;  %s465_s1 = inlined_call_operand.hbm [shape: f32[8,128], index: 1, kind: input, shape index: {}]   ;;  %s466_s2 = inlined_call_operand.vmem [shape: f32[1,128], index: 2, kind: input, shape index: {}]   ;;  %s467_s3 = inlined_call_operand.hbm [shape: f32[128,128], index: 3, kind: input, shape index: {}]   ;;  %s468_s4 = inlined_call_operand.vmem [shape: f32[1,128], index: 4, kind: input, shape index: {}]   ;;  %s469_s5 = inlined_call_operand.hbm [shape: f32[8,128], index: 5, kind: output, shape index: {}]  }
   0x1   :  { %11 = vsyncpa [#allocation6], 0 }
   0x2   :  { %12 = vsyncpa [#allocation4], 0  ;;  %s408_s18 = smov [#allocation5]   ;;  %s409_s20 = smov [#allocation2]  }
   0x3   :  { %s29_s19 = sshll.u32 %s408_s18, 4  ;;  %s19_s21 = sshll.u32 %s409_s20, 4  ;;  %s30_s19 = int_to_ptr.vmem [resolvable:$true] %s29_s19  ;;  %s20_s21 = int_to_ptr.vmem [resolvable:$true] %s19_s21 }
   0x4   :  { %s330_s22 = scalar_lea.vmem %s30_s19, 128  ;;  %p335_p1 = scmp.lt.s32.totalorder %s30_s19, %s30_s19 }
   0x5   :  { %p331_p0 = scmp.ne.s32.totalorder %s30_s19, %s330_s22  ;;  %p336_p2 = scmp.lt.s32.totalorder %s330_s22, %s330_s22 }
   0x7   :  { %p337_p3 = por %p336_p2, %p335_p1 }
   0x9   :  { %p338_p4 = pnand %p337_p3, %p331_p0 }
   0xb   :  { %341 = shalt.err (!%p338_p4)
}
   0xc   :  { %32 = dma.hbm_to_vmem [thread:$0]  %s465_s1, 128, %s30_s19, [#allocation6]  }
   0xd   :  { %s350_s25 = scalar_lea.vmem %s20_s21, 128  ;;  %p355_p6 = scmp.lt.s32.totalorder %s20_s21, %s20_s21 }
   0xe   :  { %p351_p5 = scmp.ne.s32.totalorder %s20_s21, %s350_s25  ;;  %p356_p7 = scmp.lt.s32.totalorder %s350_s25, %s350_s25 }
  0x10   :  { %p357_p8 = por %p356_p7, %p355_p6 }
  0x12   :  { %p358_p9 = pnand %p357_p8, %p351_p5 }
  0x14   :  { %361 = shalt.err (!%p358_p9)
}
  0x15   :  { %22 = dma.hbm_to_vmem [thread:$0]  %s464_s0, 128, %s20_s21, [#allocation3]  }
  0x16   :  { %s410_s28 = smov [#allocation7]  }
  0x17   :  { %s40_s29 = sshll.u32 %s410_s28, 4  ;;  %s41_s29 = int_to_ptr.vmem [resolvable:$true] %s40_s29 }
  0x18   :  { %s370_s30 = scalar_lea.vmem %s41_s29, 2048  ;;  %p375_p11 = scmp.lt.s32.totalorder %s41_s29, %s41_s29 }
  0x19   :  { %p371_p10 = scmp.ne.s32.totalorder %s41_s29, %s370_s30  ;;  %p376_p12 = scmp.lt.s32.totalorder %s370_s30, %s370_s30 }
  0x1b   :  { %p377_p13 = por %p376_p12, %p375_p11 }
  0x1d   :  { %p378_p0 = pnand %p377_p13, %p371_p10 }
  0x1f   :  { %381 = shalt.err (!%p378_p0)
}
  0x20   :  { %s411_s1 = smov 128   ;;  %s412_s6 = smov 8  }
  0x21   :  { %46 = dma.hbm_to_vmem [thread:$0]  %s467_s3, 2048, %s41_s29, [#allocation6], %s411_s1, %s411_s1, %s412_s6  }
  0x22   :  { %402 = dma.done.wait [#allocation3], 128  }
  0x23   :  { %403 = vsyncadd [#allocation3], 4294967168 }
  0x24   :  { %404 = dma.done.wait [#allocation6], 2176  }
  0x25   :  { %405 = vsyncadd [#allocation6], 4294965120  ;;  %v413_v0 = vmov 0.0   ;;  %vm414_vm0 = vmmov 0   ;;  %vm67_vm1 = vcmask 64512   ;;  %v59_v1 = vld [vmem:[#allocation5] sm:$0xff] }
  0x26   :  { %274 = vmatprep.subr.mxu0 %v413_v0  ;;  %276 = vmatprep.mubr.msk.f32.mxu0 %vm414_vm0, %v413_v0  ;;  %v58_v2 = vld [vmem:[#allocation2] sm:$0xff]  ;;  %v157_v3 = vld [vmem:[#allocation7 + $0x78] sm:$0xff]  ;;  %v155_v5 = vld [vmem:[#allocation7 + $0x68] sm:$0xff]  ;;  %s415_s11 = smov [#allocation8]  }
  0x27   :  { %279 = vmatprep.subr.mxu1 %v413_v0  ;;  %311 = vmatprep.mubr.msk.f32.mxu1 %vm414_vm0, %v413_v0  ;;  %v156_v4 = vld [vmem:[#allocation7 + $0x70] sm:$0xff]  ;;  %v154_v6 = vld [vmem:[#allocation7 + $0x60] sm:$0xff]  ;;  %v153_v7 = vld [vmem:[#allocation7 + $0x58] sm:$0xff]  ;;  %s242_s12 = sshll.u32 %s415_s11, 4  ;;  %s243_s12 = int_to_ptr.vmem [resolvable:$true] %s242_s12 }
  0x28   :  { %275 = vmatpush3.msra.mxu0 %v59_v1  ;;  %280 = vmatpush3.msra.mxu1 %v157_v3  ;;  %v152_v8 = vld [vmem:[#allocation7 + $0x50] sm:$0xff]  ;;  %v151_v9 = vld [vmem:[#allocation7 + $0x48] sm:$0xff]  ;;  %v150_v10 = vld [vmem:[#allocation7 + $0x40] sm:$0xff]  ;;  %s382_s13 = scalar_lea.vmem %s243_s12, 128  ;;  %p387_p2 = scmp.lt.s32.totalorder %s243_s12, %s243_s12 }
  0x29   :  { %277 = vmatmul.mubr.msk.f32.vlgmr.msra.gmra.mxu0 %vm67_vm1, %v58_v2  ;;  %281 = vmatprep.subr.mxu1 %v413_v0  ;;  %v149_v11 = vld [vmem:[#allocation7 + $0x38] sm:$0xff]  ;;  %v148_v12 = vld [vmem:[#allocation7 + $0x30] sm:$0xff]  ;;  %v147_v13 = vld [vmem:[#allocation7 + $0x28] sm:$0xff]  ;;  %p383_p1 = scmp.ne.s32.totalorder %s243_s12, %s382_s13  ;;  %p388_p3 = scmp.lt.s32.totalorder %s382_s13, %s382_s13 }
  0x2a   :  { %282 = vmatpush3.msra.mxu1 %v156_v4  ;;  %v146_v14 = vld [vmem:[#allocation7 + $0x20] sm:$0xff]  ;;  %v145_v15 = vld [vmem:[#allocation7 + $0x18] sm:$0xff]  ;;  %v144_v16 = vld [vmem:[#allocation7 + $0x10] sm:$0xff] }
  0x2b   :  { %283 = vmatprep.subr.mxu1 %v413_v0  ;;  %v143_v17 = vld [vmem:[#allocation7 + $0x8] sm:$0xff]  ;;  %v142_v18 = vld [vmem:[#allocation7] sm:$0xff]  ;;  %v252_v19 = vld [vmem:[%s466_s2] ss:$0 sm:$0xff]  ;;  %p389_p4 = por %p388_p3, %p387_p2 }
  0x2c   :  { %284 = vmatpush3.msra.mxu1 %v155_v5  ;;  %v254_v24 = vld [vmem:[%s468_s4] ss:$0 sm:$0xff] }
  0x2d   :  { %285 = vmatprep.subr.mxu1 %v413_v0  ;;  %p390_p5 = pnand %p389_p4, %p383_p1 }
  0x2e   :  { %286 = vmatpush3.msra.mxu1 %v154_v6 }
  0x2f   :  { %287 = vmatprep.subr.mxu1 %v413_v0 }
  0x30   :  { %288 = vmatpush3.msra.mxu1 %v153_v7 }
  0x31   :  { %289 = vmatprep.subr.mxu1 %v413_v0 }
  0x32   :  { %290 = vmatpush3.msra.mxu1 %v152_v8 }
  0x33   :  { %291 = vmatprep.subr.mxu1 %v413_v0 }
  0x34   :  { %292 = vmatpush3.msra.mxu1 %v151_v9 }
  0x35   :  { %293 = vmatprep.subr.mxu1 %v413_v0 }
  0x36   :  { %294 = vmatpush3.msra.mxu1 %v150_v10 }
  0x37   :  { %295 = vmatprep.subr.mxu1 %v413_v0 }
  0x38   :  { %296 = vmatpush3.msra.mxu1 %v149_v11 }
  0x39   :  { %297 = vmatprep.subr.mxu1 %v413_v0 }
  0x3a   :  { %298 = vmatpush3.msra.mxu1 %v148_v12 }
  0x3b   :  { %299 = vmatprep.subr.mxu1 %v413_v0 }
  0x3c   :  { %300 = vmatpush3.msra.mxu1 %v147_v13 }
  0x3d   :  { %301 = vmatprep.subr.mxu1 %v413_v0 }
  0x3e   :  { %302 = vmatpush3.msra.mxu1 %v146_v14 }
  0x3f   :  { %303 = vmatprep.subr.mxu1 %v413_v0 }
  0x40   :  { %304 = vmatpush3.msra.mxu1 %v145_v15 }
  0x41   :  { %305 = vmatprep.subr.mxu1 %v413_v0 }
  0x42   :  { %306 = vmatpush3.msra.mxu1 %v144_v16 }
  0x43   :  { %307 = vmatprep.subr.mxu1 %v413_v0 }
  0x44   :  { %308 = vmatpush3.msra.mxu1 %v143_v17 }
  0x45   :  { %309 = vmatprep.subr.mxu1 %v413_v0 }
  0x46   :  { %310 = vmatpush3.msra.mxu1 %v142_v18 }
  0xe9   :  { %v137_v20 = vpop.f32.mrf.mxu0 }
  0xea   :  { %v138_v21 = vadd.f32 %v252_v19, %v137_v20 }
  0xeb   :  { %v278_v22 = vpop.f32.mrf.mxu0 }
  0xec   :  { %v141_v23 = vmax.f32 %v138_v21, 0.0 }
  0xee   :  { %312 = vmatmul.mubr.f32.vlgmr.msra.gmra.mxu1 %v141_v23 }
 0x1ae   :  { %v231_v25 = vpop.f32.mrf.mxu1 }
 0x1af   :  { %v232_v26 = vadd.f32 %v254_v24, %v231_v25 }
 0x1b0   :  { %v313_v27 = vpop.f32.mrf.mxu1 }
 0x1b1   :  { %235 = vst [vmem:[#allocation8] sm:$0xff] %v232_v26 }
 0x1b2   :  { %393 = shalt.err (!%p390_p5)
}
 0x1b3   :  { %245 = dma.vmem_to_hbm [thread:$0]  %s243_s12, 128, %s469_s5, [#allocation4]  }
 0x1b4   :  { %406 = dma.done.wait [#allocation4], 128  }
 0x1b5   :  { %407 = vsyncadd [#allocation4], 4294967168 }
 0x1b6   :  { %249 = vsyncpa [#allocation3], 1 }
 0x1b7   :  { %250 = vsyncpa [#allocation6], 1 }
 0x1b8   :  { %251 = vsyncpa [#allocation4], 1 }

</bundles_post_ra>
